<compile_context>
chip_gen: v7x
topology: tpu7x:2x2x1
jax: 0.10.0
libtpu: 0.0.40
codegen_flags: <defaults>
</compile_context>

<pallas_src>
import math

import jax
import jax.numpy as jnp
from jax.experimental import pallas as pl
from jax.experimental.pallas import tpu as pltpu

LOG_STD_MIN = -20.0
LOG_STD_MAX = 2.0


def _round_up(x, m):
    return ((x + m - 1) // m) * m


def actor_kernel(x_ref, w1_ref, b1_ref, w2_ref, b2_ref, wh_ref, bh_ref,
                 lo_ref, hi_ref, out_ref):
    x = x_ref[...]

    # layer 1: Linear(in -> 512-padded 400) + ReLU   (MXU + VPU, f32 accumulate)
    w1 = w1_ref[...]
    h = jnp.dot(x.astype(w1.dtype), w1,
                preferred_element_type=jnp.float32) + b1_ref[...]
    h = jnp.maximum(h, 0.0)

    # layer 2: Linear(512 -> 384-padded 300) + ReLU
    w2 = w2_ref[...]
    h = jnp.dot(h.astype(w2.dtype), w2,
                preferred_element_type=jnp.float32) + b2_ref[...]
    h = jnp.maximum(h, 0.0)

    # fused heads: single matmul into a lane-dense [tb, 128] slab.
    #   columns [0, A)    -> mu       (lo=-inf, hi=+inf  => untouched)
    #   columns [A, 2A)   -> log_std  (lo=-20,  hi=2     => clamped)
    #   columns [2A, 128) -> zero pad (lo=hi=0, weights/bias zero => stays 0)
    wh = wh_ref[...]
    head = jnp.dot(h.astype(wh.dtype), wh,
                   preferred_element_type=jnp.float32) + bh_ref[...]
    head = jnp.minimum(jnp.maximum(head, lo_ref[...]), hi_ref[...])
    out_ref[...] = head.astype(out_ref.dtype)


def pack_actor_params(params, action_dim, compute_dtype=jnp.bfloat16):
    """Lane-pad hidden dims, fuse mu/log_std heads, pick MXU operand dtype.

    compute_dtype=jnp.bfloat16 (default) uses the native bf16 MXU path on all
    generations with f32 accumulation inside the kernel; biases and clamp
    bounds stay f32 so the VPU epilogue runs in f32 (v5e has no bf16 VALU).
    Zero padding of weights/biases keeps the forward semantics exact.
    """
    h1, h2 = params["w1"].shape[1], params["w2"].shape[1]          # 400, 300
    h1_pad = _round_up(h1, 128)                                    # 512
    h2_pad = _round_up(h2, 128)                                    # 384
    head_pad = max(128, _round_up(2 * action_dim, 128))            # lane-dense

    w1 = jnp.pad(params["w1"], ((0, 0), (0, h1_pad - h1)))
    b1 = jnp.pad(params["b1"], ((0, 0), (0, h1_pad - h1)))
    w2 = jnp.pad(params["w2"], ((0, h1_pad - h1), (0, h2_pad - h2)))
    b2 = jnp.pad(params["b2"], ((0, 0), (0, h2_pad - h2)))

    head_w = jnp.concatenate([params["wmu"], params["wls"]], axis=1)   # [300, 2A]
    head_b = jnp.concatenate([params["bmu"], params["bls"]], axis=1)   # [1, 2A]
    head_w = jnp.pad(head_w, ((0, h2_pad - h2), (0, head_pad - 2 * action_dim)))
    head_b = jnp.pad(head_b, ((0, 0), (0, head_pad - 2 * action_dim)))

    # Per-lane clamp bounds: mu lanes pass through, log_std lanes clamp to
    # [-20, 2], padding lanes pinned to 0.
    inf = jnp.inf
    lo = jnp.concatenate([
        jnp.full((1, action_dim), -inf, jnp.float32),
        jnp.full((1, action_dim), LOG_STD_MIN, jnp.float32),
        jnp.zeros((1, head_pad - 2 * action_dim), jnp.float32)], axis=1)
    hi = jnp.concatenate([
        jnp.full((1, action_dim), inf, jnp.float32),
        jnp.full((1, action_dim), LOG_STD_MAX, jnp.float32),
        jnp.zeros((1, head_pad - 2 * action_dim), jnp.float32)], axis=1)

    return {
        "w1": w1.astype(compute_dtype),
        "b1": b1.astype(jnp.float32),
        "w2": w2.astype(compute_dtype),
        "b2": b2.astype(jnp.float32),
        "whead": head_w.astype(compute_dtype),
        "bhead": head_b.astype(jnp.float32),
        "lo": lo,
        "hi": hi,
    }


def actor_forward(state, packed, action_dim, block_b=512):
    """state: [B, state_dim + action_dim] f32 -> (mu, log_std), each [B, action_dim]."""
    B, in_dim = state.shape
    h1 = packed["w1"].shape[1]           # 512 (padded 400)
    h2 = packed["w2"].shape[1]           # 384 (padded 300)
    head_pad = packed["whead"].shape[1]  # >= 128, lane-dense output width

    # Batch tile: multiple of the packed-sublane granule (16 for bf16 MXU
    # operands, 8 for f32, 32 for int8/fp8). For B > block_b make sure the
    # grid has >= 2 steps so ("parallel",) can use both TensorCores on v7x.
    sub = 8 * max(1, 4 // jnp.dtype(packed["w1"].dtype).itemsize)
    if B <= block_b:
        tb = _round_up(B, sub)
    else:
        tb = max(256, min(block_b, _round_up(pl.cdiv(B, 2), 256)))
    b_pad = _round_up(B, tb)
    if b_pad != B:
        state = jnp.pad(state, ((0, b_pad - B), (0, 0)))
    nb = b_pad // tb

    # Advisory cost estimate for XLA's scheduler.
    flops = 2 * b_pad * (in_dim * h1 + h1 * h2 + h2 * head_pad)
    weight_bytes = sum(int(v.size) * v.dtype.itemsize for v in packed.values())
    io_bytes = int(state.size) * state.dtype.itemsize + b_pad * head_pad * 4
    cost = pl.CostEstimate(flops=flops, transcendentals=0,
                           bytes_accessed=weight_bytes + io_bytes)

    const = lambda i: (0, 0)   # weights/biases/bounds: VMEM-resident, loaded once
    out = pl.pallas_call(
        actor_kernel,
        out_shape=jax.ShapeDtypeStruct((b_pad, head_pad), jnp.float32),
        grid=(nb,),
        in_specs=[
            pl.BlockSpec((tb, in_dim), lambda i: (i, 0)),      # state (tiled over B)
            pl.BlockSpec((in_dim, h1), const),                 # w1
            pl.BlockSpec((1, h1), const),                      # b1
            pl.BlockSpec((h1, h2), const),                     # w2
            pl.BlockSpec((1, h2), const),                      # b2
            pl.BlockSpec((h2, head_pad), const),               # fused head weight
            pl.BlockSpec((1, head_pad), const),                # fused head bias
            pl.BlockSpec((1, head_pad), const),                # per-lane clamp lo
            pl.BlockSpec((1, head_pad), const),                # per-lane clamp hi
        ],
        out_specs=pl.BlockSpec((tb, head_pad), lambda i: (i, 0)),
        compiler_params=pltpu.CompilerParams(
            dimension_semantics=("parallel",)),                # both TCs on v7x
        cost_estimate=cost,
    )(state, packed["w1"], packed["b1"], packed["w2"], packed["b2"],
      packed["whead"], packed["bhead"], packed["lo"], packed["hi"])

    # Single contiguous slice of the useful lanes, then split mu / log_std.
    used = out[:B, :2 * action_dim]
    mu = used[:, :action_dim]
    log_std = used[:, action_dim:]
    return mu, log_std


def init_actor_params(key, state_dim, action_dim):
    """Deterministic init mimicking PyTorch Linear's U(-1/sqrt(fan_in), 1/sqrt(fan_in))."""
    in_dim = state_dim + action_dim
    dims = [
        ("w1", (in_dim, 400)), ("b1", (1, 400)),
        ("w2", (400, 300)), ("b2", (1, 300)),
        ("wmu", (300, action_dim)), ("bmu", (1, action_dim)),
        ("wls", (300, action_dim)), ("bls", (1, action_dim)),
    ]
    fan_in = {"w1": in_dim, "b1": in_dim, "w2": 400, "b2": 400,
              "wmu": 300, "bmu": 300, "wls": 300, "bls": 300}
    params = {}
    keys = jax.random.split(key, len(dims))
    for (name, shape), k in zip(dims, keys):
        bound = 1.0 / math.sqrt(fan_in[name])
        params[name] = jax.random.uniform(
            k, shape, dtype=jnp.float32, minval=-bound, maxval=bound)
    return params


def actor_reference(state, params):
    """Plain-JAX reference for the same forward pass (f32, unpadded)."""
    a = jnp.maximum(state @ params["w1"] + params["b1"], 0.0)
    a = jnp.maximum(a @ params["w2"] + params["b2"], 0.0)
    mu = a @ params["wmu"] + params["bmu"]
    log_std = jnp.clip(a @ params["wls"] + params["bls"], LOG_STD_MIN, LOG_STD_MAX)
    return mu, log_std


if __name__ == "__main__":
    state_dim = 11
    action_dim = 3
    batch = 2

    key = jax.random.PRNGKey(0)
    pkey, xkey = jax.random.split(key)
    params = init_actor_params(pkey, state_dim, action_dim)

    # Module's l1 expects state_dim + action_dim features (forward is called
    # with the [state, action] concat in BCQ), so the input has 14 features.
    state = jax.random.normal(xkey, (batch, state_dim + action_dim),
                              dtype=jnp.float32)

    mu_ref, ls_ref = actor_reference(state, params)

    # f32 operand path (exact semantics): tight tolerance.
    packed_f32 = pack_actor_params(params, action_dim, compute_dtype=jnp.float32)
    mu, log_std = actor_forward(state, packed_f32, action_dim)
    jax.block_until_ready((mu, log_std))
    assert mu.shape == (batch, action_dim) and log_std.shape == (batch, action_dim)
    assert jnp.allclose(mu, mu_ref, atol=1e-5, rtol=1e-5)
    assert jnp.allclose(log_std, ls_ref, atol=1e-5, rtol=1e-5)

    # default bf16 MXU-operand path (f32 accumulate): loose tolerance vs f32 ref.
    packed_bf16 = pack_actor_params(params, action_dim)
    mu_b, ls_b = actor_forward(state, packed_bf16, action_dim)
    jax.block_until_ready((mu_b, ls_b))
    assert mu_b.shape == (batch, action_dim) and ls_b.shape == (batch, action_dim)
    assert jnp.all(jnp.isfinite(mu_b)) and jnp.all(jnp.isfinite(ls_b))
    assert jnp.allclose(mu_b, mu_ref, atol=1e-1, rtol=1e-1)
    assert jnp.allclose(ls_b, ls_ref, atol=1e-1, rtol=1e-1)

    print("KERNEL_OK")
</pallas_src>

<mosaic_0001>
module attributes {stable_mosaic.version = 11 : i64} {
  func.func @actor_kernel(%arg0: i32, %arg1: memref<8x14xf32, #tpu.memory_space<vmem>>, %arg2: memref<14x512xf32, #tpu.memory_space<vmem>>, %arg3: memref<1x512xf32, #tpu.memory_space<vmem>>, %arg4: memref<512x384xf32, #tpu.memory_space<vmem>>, %arg5: memref<1x384xf32, #tpu.memory_space<vmem>>, %arg6: memref<384x128xf32, #tpu.memory_space<vmem>>, %arg7: memref<1x128xf32, #tpu.memory_space<vmem>>, %arg8: memref<1x128xf32, #tpu.memory_space<vmem>>, %arg9: memref<1x128xf32, #tpu.memory_space<vmem>>, %arg10: memref<8x128xf32, #tpu.memory_space<vmem>>) attributes {dimension_semantics = [#tpu.dimension_semantics<parallel>], iteration_bounds = array<i64: 1>, scalar_prefetch = 0 : i64, scratch_operands = 0 : i64, tpu.core_type = #tpu.core_type<tc>, window_params = [{transform_indices = @transform_0, window_bounds = array<i64: 8, 14>}, {pipeline_mode = #tpu.pipeline_mode<synchronous>, transform_indices = @transform_1, window_bounds = array<i64: 14, 512>}, {pipeline_mode = #tpu.pipeline_mode<synchronous>, transform_indices = @transform_2, window_bounds = array<i64: 1, 512>}, {pipeline_mode = #tpu.pipeline_mode<synchronous>, transform_indices = @transform_3, window_bounds = array<i64: 512, 384>}, {pipeline_mode = #tpu.pipeline_mode<synchronous>, transform_indices = @transform_4, window_bounds = array<i64: 1, 384>}, {pipeline_mode = #tpu.pipeline_mode<synchronous>, transform_indices = @transform_5, window_bounds = array<i64: 384, 128>}, {pipeline_mode = #tpu.pipeline_mode<synchronous>, transform_indices = @transform_6, window_bounds = array<i64: 1, 128>}, {pipeline_mode = #tpu.pipeline_mode<synchronous>, transform_indices = @transform_7, window_bounds = array<i64: 1, 128>}, {pipeline_mode = #tpu.pipeline_mode<synchronous>, transform_indices = @transform_8, window_bounds = array<i64: 1, 128>}, {transform_indices = @transform_9, window_bounds = array<i64: 8, 128>}]} {
    %c0 = arith.constant 0 : index
    %c0_0 = arith.constant 0 : index
    %0 = vector.load %arg1[%c0, %c0_0] : memref<8x14xf32, #tpu.memory_space<vmem>>, vector<8x14xf32>
    %c0_1 = arith.constant 0 : index
    %c0_2 = arith.constant 0 : index
    %1 = vector.load %arg2[%c0_1, %c0_2] : memref<14x512xf32, #tpu.memory_space<vmem>>, vector<14x512xf32>
    %cst = arith.constant dense<0.000000e+00> : vector<8x512xf32>
    %2 = tpu.matmul %0, %1, %cst {dimension_numbers = #tpu.dot_dimension_numbers<[1], [0], [0], [1], [0, 0, 1, 1], [], []>} : vector<8x14xf32>, vector<14x512xf32>, vector<8x512xf32> -> vector<8x512xf32>
    %c0_3 = arith.constant 0 : index
    %c0_4 = arith.constant 0 : index
    %3 = vector.load %arg3[%c0_3, %c0_4] : memref<1x512xf32, #tpu.memory_space<vmem>>, vector<1x512xf32>
    %4 = vector.broadcast %3 : vector<1x512xf32> to vector<8x512xf32>
    %5 = arith.addf %2, %4 : vector<8x512xf32>
    %cst_5 = arith.constant 0.000000e+00 : f32
    %6 = vector.broadcast %cst_5 : f32 to vector<8x512xf32>
    %7 = arith.maximumf %5, %6 : vector<8x512xf32>
    %c0_6 = arith.constant 0 : index
    %c0_7 = arith.constant 0 : index
    %8 = vector.load %arg4[%c0_6, %c0_7] : memref<512x384xf32, #tpu.memory_space<vmem>>, vector<512x384xf32>
    %cst_8 = arith.constant dense<0.000000e+00> : vector<8x384xf32>
    %9 = tpu.matmul %7, %8, %cst_8 {dimension_numbers = #tpu.dot_dimension_numbers<[1], [0], [0], [1], [0, 0, 1, 1], [], []>} : vector<8x512xf32>, vector<512x384xf32>, vector<8x384xf32> -> vector<8x384xf32>
    %c0_9 = arith.constant 0 : index
    %c0_10 = arith.constant 0 : index
    %10 = vector.load %arg5[%c0_9, %c0_10] : memref<1x384xf32, #tpu.memory_space<vmem>>, vector<1x384xf32>
    %11 = vector.broadcast %10 : vector<1x384xf32> to vector<8x384xf32>
    %12 = arith.addf %9, %11 : vector<8x384xf32>
    %cst_11 = arith.constant 0.000000e+00 : f32
    %13 = vector.broadcast %cst_11 : f32 to vector<8x384xf32>
    %14 = arith.maximumf %12, %13 : vector<8x384xf32>
    %c0_12 = arith.constant 0 : index
    %c0_13 = arith.constant 0 : index
    %15 = vector.load %arg6[%c0_12, %c0_13] : memref<384x128xf32, #tpu.memory_space<vmem>>, vector<384x128xf32>
    %cst_14 = arith.constant dense<0.000000e+00> : vector<8x128xf32>
    %16 = tpu.matmul %14, %15, %cst_14 {dimension_numbers = #tpu.dot_dimension_numbers<[1], [0], [0], [1], [0, 0, 1, 1], [], []>} : vector<8x384xf32>, vector<384x128xf32>, vector<8x128xf32> -> vector<8x128xf32>
    %c0_15 = arith.constant 0 : index
    %c0_16 = arith.constant 0 : index
    %17 = vector.load %arg7[%c0_15, %c0_16] : memref<1x128xf32, #tpu.memory_space<vmem>>, vector<1x128xf32>
    %18 = vector.broadcast %17 : vector<1x128xf32> to vector<8x128xf32>
    %19 = arith.addf %16, %18 : vector<8x128xf32>
    %c0_17 = arith.constant 0 : index
    %c0_18 = arith.constant 0 : index
    %20 = vector.load %arg8[%c0_17, %c0_18] : memref<1x128xf32, #tpu.memory_space<vmem>>, vector<1x128xf32>
    %21 = vector.broadcast %20 : vector<1x128xf32> to vector<8x128xf32>
    %22 = arith.maximumf %19, %21 : vector<8x128xf32>
    %c0_19 = arith.constant 0 : index
    %c0_20 = arith.constant 0 : index
    %23 = vector.load %arg9[%c0_19, %c0_20] : memref<1x128xf32, #tpu.memory_space<vmem>>, vector<1x128xf32>
    %24 = vector.broadcast %23 : vector<1x128xf32> to vector<8x128xf32>
    %25 = arith.minimumf %22, %24 : vector<8x128xf32>
    %c0_21 = arith.constant 0 : index
    %c0_22 = arith.constant 0 : index
    %26 = vector.load %arg10[%c0_21, %c0_22] : memref<8x128xf32, #tpu.memory_space<vmem>>, vector<8x128xf32>
    tpu.vector_store %arg10[%c0_21, %c0_22], %25 {strides = array<i32>} : memref<8x128xf32, #tpu.memory_space<vmem>>, vector<8x128xf32>,
    return
  }
  func.func @transform_0(%arg0: i32) -> (i32, i32) {
    %c0_i32 = arith.constant 0 : i32
    %c0_i32_0 = arith.constant 0 : i32
    return %arg0, %c0_i32 : i32, i32
  }
  func.func @transform_1(%arg0: i32) -> (i32, i32) {
    %c0_i32 = arith.constant 0 : i32
    %c0_i32_0 = arith.constant 0 : i32
    %c0_i32_1 = arith.constant 0 : i32
    return %c0_i32, %c0_i32_0 : i32, i32
  }
  func.func @transform_2(%arg0: i32) -> (i32, i32) {
    %c0_i32 = arith.constant 0 : i32
    %c0_i32_0 = arith.constant 0 : i32
    %c0_i32_1 = arith.constant 0 : i32
    return %c0_i32, %c0_i32_0 : i32, i32
  }
  func.func @transform_3(%arg0: i32) -> (i32, i32) {
    %c0_i32 = arith.constant 0 : i32
    %c0_i32_0 = arith.constant 0 : i32
    %c0_i32_1 = arith.constant 0 : i32
    return %c0_i32, %c0_i32_0 : i32, i32
  }
  func.func @transform_4(%arg0: i32) -> (i32, i32) {
    %c0_i32 = arith.constant 0 : i32
    %c0_i32_0 = arith.constant 0 : i32
    %c0_i32_1 = arith.constant 0 : i32
    return %c0_i32, %c0_i32_0 : i32, i32
  }
  func.func @transform_5(%arg0: i32) -> (i32, i32) {
    %c0_i32 = arith.constant 0 : i32
    %c0_i32_0 = arith.constant 0 : i32
    %c0_i32_1 = arith.constant 0 : i32
    return %c0_i32, %c0_i32_0 : i32, i32
  }
  func.func @transform_6(%arg0: i32) -> (i32, i32) {
    %c0_i32 = arith.constant 0 : i32
    %c0_i32_0 = arith.constant 0 : i32
    %c0_i32_1 = arith.constant 0 : i32
    return %c0_i32, %c0_i32_0 : i32, i32
  }
  func.func @transform_7(%arg0: i32) -> (i32, i32) {
    %c0_i32 = arith.constant 0 : i32
    %c0_i32_0 = arith.constant 0 : i32
    %c0_i32_1 = arith.constant 0 : i32
    return %c0_i32, %c0_i32_0 : i32, i32
  }
  func.func @transform_8(%arg0: i32) -> (i32, i32) {
    %c0_i32 = arith.constant 0 : i32
    %c0_i32_0 = arith.constant 0 : i32
    %c0_i32_1 = arith.constant 0 : i32
    return %c0_i32, %c0_i32_0 : i32, i32
  }
  func.func @transform_9(%arg0: i32) -> (i32, i32) {
    %c0_i32 = arith.constant 0 : i32
    %c0_i32_0 = arith.constant 0 : i32
    return %arg0, %c0_i32 : i32, i32
  }
}

</mosaic_0001>

<bundles_post_ra>
// kernel: tpu_custom_call.1
= control target key start
LH: loop header
LB: loop body
LE: loop exit
PB: predicated region body
PF: predicated region fallthrough
CT: control target
= control target key end

     0   :  { %14 = vsyncpa [#allocation3], 0  ;;  %s1753_s0 = inlined_call_operand.hbm [shape: f32[8,14], index: 0, kind: input, shape index: {}]   ;;  %s1754_s1 = inlined_call_operand.hbm [shape: f32[14,512], index: 1, kind: input, shape index: {}]   ;;  %s1755_s2 = inlined_call_operand.vmem [shape: f32[1,512], index: 2, kind: input, shape index: {}]   ;;  %s1756_s3 = inlined_call_operand.hbm [shape: f32[512,384], index: 3, kind: input, shape index: {}]   ;;  %s1757_s4 = inlined_call_operand.vmem [shape: f32[1,384], index: 4, kind: input, shape index: {}]   ;;  %s1758_s5 = inlined_call_operand.hbm [shape: f32[384,128], index: 5, kind: input, shape index: {}]   ;;  %s1759_s6 = inlined_call_operand.vmem [shape: f32[1,128], index: 6, kind: input, shape index: {}]   ;;  %s1760_s7 = inlined_call_operand.vmem [shape: f32[1,128], index: 7, kind: input, shape index: {}]   ;;  %s1761_s8 = inlined_call_operand.vmem [shape: f32[1,128], index: 8, kind: input, shape index: {}]   ;;  %s1762_s9 = inlined_call_operand.hbm [shape: f32[8,128], index: 9, kind: output, shape index: {}]  }
   0x1   :  { %15 = vsyncpa [#allocation6], 0 }
   0x2   :  { %16 = vsyncpa [#allocation9], 0 }
   0x3   :  { %17 = vsyncpa [#allocation4], 0  ;;  %s1566_s30 = smov [#allocation5]   ;;  %s1448_s13 = scalar_lea.hbm %s1754_s1, 1024 }
   0x4   :  { %s33_s10 = sshll.u32 %s1566_s30, 4  ;;  %p1449_p0 = scmp.ne.s32.totalorder %s1754_s1, %s1448_s13  ;;  %s34_s10 = int_to_ptr.vmem [resolvable:$true] %s33_s10 }
   0x5   :  { %p1452_p1 = scmp.lt.u32.totalorder %s1448_s13, %s1754_s1 }
   0x7   :  { %p1454_p2 = pnand %p1452_p1, %p1449_p0 }
   0x9   :  { %1457 = shalt.err (!%p1454_p2)
}
   0xa   :  { %s1458_s18 = scalar_lea.vmem %s34_s10, 1024  ;;  %p1463_p4 = scmp.lt.s32.totalorder %s34_s10, %s34_s10 }
   0xb   :  { %p1459_p3 = scmp.ne.s32.totalorder %s34_s10, %s1458_s18  ;;  %p1464_p5 = scmp.lt.s32.totalorder %s1458_s18, %s1458_s18 }
   0xd   :  { %p1465_p6 = por %p1464_p5, %p1463_p4 }
   0xf   :  { %p1466_p7 = pnand %p1465_p6, %p1459_p3 }
  0x11   :  { %1469 = shalt.err (!%p1466_p7)
}
  0x12   :  { %s1567_s19 = smov 512   ;;  %s1568_s20 = smov 32  }
  0x13   :  { %39 = dma.hbm_to_vmem [thread:$0]  %s1754_s1, 1024, %s34_s10, [#allocation6], %s1567_s19, %s1567_s19, %s1568_s20  }
  0x14   :  { %s1569_s23 = smov [#allocation2]   ;;  %s1570_s25 = smov [#allocation7]  }
  0x15   :  { %s24_s24 = sshll.u32 %s1569_s23, 4  ;;  %s47_s26 = sshll.u32 %s1570_s25, 4  ;;  %s25_s24 = int_to_ptr.vmem [resolvable:$true] %s24_s24  ;;  %s48_s26 = int_to_ptr.vmem [resolvable:$true] %s47_s26 }
  0x16   :  { %s1470_s29 = scalar_lea.hbm %s1753_s0, 128 }
  0x17   :  { %p1471_p8 = scmp.ne.s32.totalorder %s1753_s0, %s1470_s29  ;;  %p1474_p9 = scmp.lt.u32.totalorder %s1470_s29, %s1753_s0 }
  0x19   :  { %p1476_p10 = pnand %p1474_p9, %p1471_p8 }
  0x1b   :  { %1479 = shalt.err (!%p1476_p10)
}
  0x1c   :  { %s1480_s1 = scalar_lea.vmem %s25_s24, 128  ;;  %p1485_p12 = scmp.lt.s32.totalorder %s25_s24, %s25_s24 }
  0x1d   :  { %p1481_p11 = scmp.ne.s32.totalorder %s25_s24, %s1480_s1  ;;  %p1486_p13 = scmp.lt.s32.totalorder %s1480_s1, %s1480_s1 }
  0x1f   :  { %p1487_p0 = por %p1486_p13, %p1485_p12 }
  0x21   :  { %p1488_p1 = pnand %p1487_p0, %p1481_p11 }
  0x23   :  { %1491 = shalt.err (!%p1488_p1)
}
  0x24   :  { %27 = dma.hbm_to_vmem [thread:$0]  %s1753_s0, 128, %s25_s24, [#allocation3]  }
  0x25   :  { %s1492_s17 = scalar_lea.hbm %s1756_s3, 24576 }
  0x26   :  { %p1493_p2 = scmp.ne.s32.totalorder %s1756_s3, %s1492_s17  ;;  %p1496_p3 = scmp.lt.u32.totalorder %s1492_s17, %s1756_s3 }
  0x28   :  { %p1498_p4 = pnand %p1496_p3, %p1493_p2 }
  0x2a   :  { %1501 = shalt.err (!%p1498_p4)
}
  0x2b   :  { %s1502_s22 = scalar_lea.vmem %s48_s26, 24576  ;;  %p1507_p6 = scmp.lt.s32.totalorder %s48_s26, %s48_s26 }
  0x2c   :  { %p1503_p5 = scmp.ne.s32.totalorder %s48_s26, %s1502_s22  ;;  %p1508_p7 = scmp.lt.s32.totalorder %s1502_s22, %s1502_s22 }
  0x2e   :  { %p1509_p8 = por %p1508_p7, %p1507_p6 }
  0x30   :  { %p1510_p9 = pnand %p1509_p8, %p1503_p5 }
  0x32   :  { %1513 = shalt.err (!%p1510_p9)
}
  0x33   :  { %s1571_s0 = smov 384   ;;  %s1572_s23 = smov 24  }
  0x34   :  { %53 = dma.hbm_to_vmem [thread:$0]  %s1756_s3, 24576, %s48_s26, [#allocation6], %s1571_s0, %s1571_s0, %s1572_s23  }
  0x35   :  { %s1573_s27 = smov [#allocation8]   ;;  %s1514_s11 = scalar_lea.hbm %s1758_s5, 6144 }
  0x36   :  { %s61_s28 = sshll.u32 %s1573_s27, 4  ;;  %p1515_p10 = scmp.ne.s32.totalorder %s1758_s5, %s1514_s11  ;;  %s62_s28 = int_to_ptr.vmem [resolvable:$true] %s61_s28 }
  0x37   :  { %p1518_p11 = scmp.lt.u32.totalorder %s1514_s11, %s1758_s5 }
  0x39   :  { %p1520_p12 = pnand %p1518_p11, %p1515_p10 }
  0x3b   :  { %1523 = shalt.err (!%p1520_p12)
}
  0x3c   :  { %s1524_s14 = scalar_lea.vmem %s62_s28, 6144  ;;  %p1529_p0 = scmp.lt.s32.totalorder %s62_s28, %s62_s28 }
  0x3d   :  { %p1525_p13 = scmp.ne.s32.totalorder %s62_s28, %s1524_s14  ;;  %p1530_p1 = scmp.lt.s32.totalorder %s1524_s14, %s1524_s14 }
  0x3f   :  { %p1531_p2 = por %p1530_p1, %p1529_p0 }
  0x41   :  { %p1532_p3 = pnand %p1531_p2, %p1525_p13 }
  0x43   :  { %1535 = shalt.err (!%p1532_p3)
}
  0x44   :  { %s1574_s3 = smov 128   ;;  %s1575_s26 = smov 8  }
  0x45   :  { %67 = dma.hbm_to_vmem [thread:$0]  %s1758_s5, 6144, %s62_s28, [#allocation9], %s1574_s3, %s1574_s3, %s1575_s26  }
  0x46   :  { %1558 = dma.done.wait [#allocation3], 128  }
  0x47   :  { %1559 = vsyncadd [#allocation3], 4294967168 }
  0x48   :  { %1560 = dma.done.wait [#allocation6], 25600  }
  0x49   :  { %1561 = vsyncadd [#allocation6], 4294941696 }
  0x4a   :  { %1562 = dma.done.wait [#allocation9], 6144  }
  0x4b   :  { %1563 = vsyncadd [#allocation9], 4294961152  ;;  %v1576_v0 = vmov 0.0   ;;  %vm121_vm0 = vcmask 1045504   ;;  %vm1577_vm1 = vmmov 1   ;;  %v88_v2 = vld [vmem:[#allocation5 + $0x8] sm:$0xff] }
  0x4c   :  { %198 = vmatprep.mubr.f32.mxu0 %v1576_v0  ;;  %269 = vmatprep.mubr.f32.mxu1 %v1576_v0  ;;  %vm1681_vm2 = vmpackc.low %vm121_vm0, %vm1577_vm1  ;;  %v92_v3 = vld [vmem:[#allocation5 + $0x28] sm:$0x3f]  ;;  %v87_v4 = vld [vmem:[#allocation5] sm:$0xff]  ;;  %vm117_vm3 = vcmask 113664   ;;  %vm1579_vm4 = vmmov 0   ;;  %s1580_s23 = smov [#allocation10]  }
  0x4d   :  { %v1169_v5 = vpack.c.bf16 %v92_v3, %v88_v2  ;;  %v91_v6 = vld [vmem:[#allocation5 + $0x20] sm:$0x3f]  ;;  %v90_v7 = vld [vmem:[#allocation5 + $0x18] sm:$0xff]  ;;  %v89_v11 = vld [vmem:[#allocation5 + $0x10] sm:$0xff]  ;;  %s992_s24 = sshll.u32 %s1580_s23, 4  ;;  %s993_s24 = int_to_ptr.vmem [resolvable:$true] %s992_s24 }
  0x4e   :  { %v1172_v8 = vpack.c.bf16 %v91_v6, %v87_v4  ;;  %v86_v9 = vld [vmem:[#allocation2] sm:$0xff]  ;;  %v93_v12 = vld [vmem:[#allocation5 + $0x30] sm:$0x3f]  ;;  %v281_v15 = vld [vmem:[#allocation7 + $0x8] sm:$0xff]  ;;  %s1536_s25 = scalar_lea.vmem %s993_s24, 128  ;;  %p1541_p5 = scmp.lt.s32.totalorder %s993_s24, %s993_s24 }
  0x4f   :  { %v94_v10 = vld [vmem:[#allocation5 + $0x38] sm:$0x3f]  ;;  %1171 = vmatprep.subr.msk.bf16.mxu0 %vm1681_vm2, %v1169_v5  ;;  %v1178_v14 = vpack.c.bf16 %v93_v12, %v89_v11  ;;  %v284_v16 = vld [vmem:[#allocation7 + $0x20] sm:$0xff]  ;;  %v290_v21 = vld [vmem:[#allocation7 + $0x50] sm:$0xff]  ;;  %p1537_p4 = scmp.ne.s32.totalorder %s993_s24, %s1536_s25  ;;  %p1542_p6 = scmp.lt.s32.totalorder %s1536_s25, %s1536_s25 }
  0x50   :  { %v1175_v13 = vpack.c.bf16 %v94_v10, %v90_v7  ;;  %v280_v17 = vld [vmem:[#allocation7] sm:$0xff]  ;;  %1174 = vmatpush1.bf16.msk.msra.mxu0 %vm1681_vm2, %v1172_v8  ;;  %v1181_v18 = vpack.c.bf16 %v284_v16, %v281_v15  ;;  %v283_v19 = vld [vmem:[#allocation7 + $0x18] sm:$0xff]  ;;  %v286_v24 = vld [vmem:[#allocation7 + $0x30] sm:$0xff] }
  0x51   :  { %v287_v20 = vld [vmem:[#allocation7 + $0x38] sm:$0xff]  ;;  %v1183_v22 = vpack.c.bf16 %v283_v19, %v280_v17  ;;  %v289_v25 = vld [vmem:[#allocation7 + $0x48] sm:$0xff]  ;;  %v296_v27 = vld [vmem:[#allocation7 + $0x80] sm:$0xff]  ;;  %p1543_p7 = por %p1542_p6, %p1541_p5 }
  0x52   :  { %1177 = vmatprep.subr.msk.bf16.mxu1 %vm1681_vm2, %v1175_v13  ;;  %v1185_v23 = vpack.c.bf16 %v290_v21, %v287_v20  ;;  %1182 = vmatprep.subr.bf16.mxu0 %v1181_v18  ;;  %v293_v26 = vld [vmem:[#allocation7 + $0x68] sm:$0xff]  ;;  %v1187_v28 = vpack.c.bf16 %v289_v25, %v286_v24  ;;  %v292_v30 = vld [vmem:[#allocation7 + $0x60] sm:$0xff]  ;;  %v295_v31 = vld [vmem:[#allocation7 + $0x78] sm:$0xff] }
  0x53   :  { %1180 = vmatpush1.bf16.msk.msra.mxu1 %vm1681_vm2, %v1178_v14  ;;  %1005 = vmatmul.mubr.msk.f32.vlgmr.msra.gmra.mrb[0].mxu0 %vm117_vm3, %v86_v9  ;;  %v1189_v29 = vpack.c.bf16 %v296_v27, %v293_v26  ;;  %v299_v32 = vld [vmem:[#allocation7 + $0x98] sm:$0xff]  ;;  %v302_v33 = vld [vmem:[#allocation7 + $0xb0] sm:$0xff]  ;;  %v1191_v34 = vpack.c.bf16 %v295_v31, %v292_v30  ;;  %v301_v37 = vld [vmem:[#allocation7 + $0xa8] sm:$0xff]  ;;  %p1544_p8 = pnand %p1543_p7, %p1537_p4 }
  0x54   :  { %1184 = vmatpush1.bf16.msra.mxu0 %v1183_v22  ;;  %v1193_v35 = vpack.c.bf16 %v302_v33, %v299_v32  ;;  %v298_v36 = vld [vmem:[#allocation7 + $0x90] sm:$0xff]  ;;  %v305_v38 = vld [vmem:[#allocation7 + $0xc8] sm:$0xff]  ;;  %v308_v39 = vld [vmem:[#allocation7 + $0xe0] sm:$0xff] }
  0x55   :  { %1186 = vmatprep.subr.bf16.mxu0 %v1185_v23  ;;  %v330_v40 = vld [vmem:[#allocation7 + $0x190] sm:$0xff]  ;;  %v333_v41 = vld [vmem:[#allocation7 + $0x1a8] sm:$0xff]  ;;  %v1195_v44 = vpack.c.bf16 %v301_v37, %v298_v36  ;;  %v304_v45 = vld [vmem:[#allocation7 + $0xc0] sm:$0xff]  ;;  %v1197_v48 = vpack.c.bf16 %v308_v39, %v305_v38 }
  0x56   :  { %1008 = vmatmul.mubr.msk.f32.vlgmr.msra.gmra.mrb[0].mxu1 %vm117_vm3, %v86_v9  ;;  %v1309_v42 = vpack.c.bf16 %v333_v41, %v330_v40  ;;  %v282_v43 = vld [vmem:[#allocation7 + $0x10] sm:$0xff]  ;;  %v307_v46 = vld [vmem:[#allocation7 + $0xd8] sm:$0xff]  ;;  %v285_v47 = vld [vmem:[#allocation7 + $0x28] sm:$0xff] }
  0x57   :  { %v311_v49 = vld [vmem:[#allocation7 + $0xf8] sm:$0xff]  ;;  %v1311_v50 = vpack.c.bf16 %v285_v47, %v282_v43  ;;  %v336_v51 = vld [vmem:[#allocation7 + $0x1c0] sm:$0xff]  ;;  %v314_v53 = vld [vmem:[#allocation7 + $0x110] sm:$0xff]  ;;  %v1199_v59 = vpack.c.bf16 %v307_v46, %v304_v45 }
  0x58   :  { %1188 = vmatpush1.bf16.msra.mxu0 %v1187_v28  ;;  %1310 = vmatprep.subr.bf16.mxu1 %v1309_v42  ;;  %v339_v52 = vld [vmem:[#allocation7 + $0x1d8] sm:$0xff]  ;;  %v288_v55 = vld [vmem:[#allocation7 + $0x40] sm:$0xff]  ;;  %v342_v58 = vld [vmem:[#allocation7 + $0x1f0] sm:$0xff]  ;;  %v1201_v63 = vpack.c.bf16 %v314_v53, %v311_v49 }
  0x59   :  { %1190 = vmatprep.subr.bf16.mxu0 %v1189_v29  ;;  %v1313_v54 = vpack.c.bf16 %v339_v52, %v336_v51  ;;  %v291_v56 = vld [vmem:[#allocation7 + $0x58] sm:$0xff]  ;;  %1312 = vmatpush3.bf16.msra.mxu1 %v1311_v50  ;;  %v310_v60 = vld [vmem:[#allocation7 + $0xf0] sm:$0xff]  ;;  %v313_v61 = vld [vmem:[#allocation7 + $0x108] sm:$0xff] }
  0x5a   :  { %v1315_v57 = vpack.c.bf16 %v291_v56, %v288_v55  ;;  %v345_v62 = vld [vmem:[#allocation7 + $0x208] sm:$0xff]  ;;  %v294_v3 = vld [vmem:[#allocation7 + $0x70] sm:$0xff]  ;;  %v320_v5 = vld [vmem:[#allocation7 + $0x140] sm:$0xff]  ;;  %v1203_v9 = vpack.c.bf16 %v313_v61, %v310_v60 }
  0x5b   :  { %1314 = vmatprep.subr.bf16.mxu1 %v1313_v54  ;;  %v317_v1 = vld [vmem:[#allocation7 + $0x128] sm:$0xff]  ;;  %v1317_v2 = vpack.c.bf16 %v345_v62, %v342_v58  ;;  %v348_v6 = vld [vmem:[#allocation7 + $0x220] sm:$0xff]  ;;  %v351_v7 = vld [vmem:[#allocation7 + $0x238] sm:$0xff] }
  0x5c   :  { %1192 = vmatpush1.bf16.msra.mxu0 %v1191_v34  ;;  %v297_v4 = vld [vmem:[#allocation7 + $0x88] sm:$0xff]  ;;  %v316_v10 = vld [vmem:[#allocation7 + $0x120] sm:$0xff]  ;;  %v1321_v11 = vpack.c.bf16 %v351_v7, %v348_v6  ;;  %v303_v13 = vld [vmem:[#allocation7 + $0xb8] sm:$0xff]  ;;  %v1205_v14 = vpack.c.bf16 %v320_v5, %v317_v1 }
  0x5d   :  { %1194 = vmatprep.subr.bf16.mxu0 %v1193_v35  ;;  %1316 = vmatpush3.bf16.msra.mxu1 %v1315_v57  ;;  %v1319_v8 = vpack.c.bf16 %v297_v4, %v294_v3  ;;  %v300_v12 = vld [vmem:[#allocation7 + $0xa0] sm:$0xff]  ;;  %v319_v15 = vld [vmem:[#allocation7 + $0x138] sm:$0xff]  ;;  %v354_v16 = vld [vmem:[#allocation7 + $0x250] sm:$0xff] }
  0x5e   :  { %1318 = vmatprep.subr.bf16.mxu1 %v1317_v2  ;;  %v357_v17 = vld [vmem:[#allocation7 + $0x268] sm:$0xff]  ;;  %v323_v18 = vld [vmem:[#allocation7 + $0x158] sm:$0xff]  ;;  %v326_v19 = vld [vmem:[#allocation7 + $0x170] sm:$0xff]  ;;  %v1323_v20 = vpack.c.bf16 %v303_v13, %v300_v12  ;;  %v1207_v21 = vpack.c.bf16 %v319_v15, %v316_v10 }
  0x5f   :  { %v322_v22 = vld [vmem:[#allocation7 + $0x150] sm:$0xff]  ;;  %v1325_v23 = vpack.c.bf16 %v357_v17, %v354_v16  ;;  %v309_v25 = vld [vmem:[#allocation7 + $0xe8] sm:$0xff]  ;;  %v1209_v26 = vpack.c.bf16 %v326_v19, %v323_v18  ;;  %v360_v28 = vld [vmem:[#allocation7 + $0x280] sm:$0xff] }
  0x60   :  { %1196 = vmatpush1.bf16.msra.mxu0 %v1195_v44  ;;  %v306_v24 = vld [vmem:[#allocation7 + $0xd0] sm:$0xff]  ;;  %v325_v27 = vld [vmem:[#allocation7 + $0x168] sm:$0xff]  ;;  %v363_v29 = vld [vmem:[#allocation7 + $0x298] sm:$0xff] }
  0x61   :  { %1198 = vmatprep.subr.bf16.mxu0 %v1197_v48  ;;  %1320 = vmatpush3.bf16.msra.mxu1 %v1319_v8  ;;  %v329_v30 = vld [vmem:[#allocation7 + $0x188] sm:$0xff]  ;;  %v332_v31 = vld [vmem:[#allocation7 + $0x1a0] sm:$0xff]  ;;  %v1327_v32 = vpack.c.bf16 %v309_v25, %v306_v24  ;;  %v1211_v33 = vpack.c.bf16 %v325_v27, %v322_v22  ;;  %v1329_v35 = vpack.c.bf16 %v363_v29, %v360_v28  ;;  %v315_v37 = vld [vmem:[#allocation7 + $0x118] sm:$0xff] }
  0x62   :  { %1322 = vmatprep.subr.bf16.mxu1 %v1321_v11  ;;  %v328_v34 = vld [vmem:[#allocation7 + $0x180] sm:$0xff]  ;;  %v1213_v38 = vpack.c.bf16 %v332_v31, %v329_v30  ;;  %v331_v39 = vld [vmem:[#allocation7 + $0x198] sm:$0xff]  ;;  %v366_v40 = vld [vmem:[#allocation7 + $0x2b0] sm:$0xff] }
  0x63   :  { %v312_v36 = vld [vmem:[#allocation7 + $0x100] sm:$0xff]  ;;  %v369_v41 = vld [vmem:[#allocation7 + $0x2c8] sm:$0xff]  ;;  %v335_v42 = vld [vmem:[#allocation7 + $0x1b8] sm:$0xff]  ;;  %v1215_v45 = vpack.c.bf16 %v331_v39, %v328_v34  ;;  %v97_v39 = vlaneseq }
  0x64   :  { %1200 = vmatpush1.bf16.msra.mxu0 %v1199_v59  ;;  %v338_v43 = vld [vmem:[#allocation7 + $0x1d0] sm:$0xff]  ;;  %v1331_v44 = vpack.c.bf16 %v315_v37, %v312_v36  ;;  %v1333_v46 = vpack.c.bf16 %v369_v41, %v366_v40  ;;  %v321_v48 = vld [vmem:[#allocation7 + $0x148] sm:$0xff]  ;;  %v344_v53 = vld [vmem:[#allocation7 + $0x200] sm:$0xff] }
  0x65   :  { %1202 = vmatprep.subr.bf16.mxu0 %v1201_v63  ;;  %1324 = vmatpush3.bf16.msra.mxu1 %v1323_v20  ;;  %v318_v47 = vld [vmem:[#allocation7 + $0x130] sm:$0xff]  ;;  %v1217_v49 = vpack.c.bf16 %v338_v43, %v335_v42  ;;  %v337_v51 = vld [vmem:[#allocation7 + $0x1c8] sm:$0xff]  ;;  %v340_v57 = vld [vmem:[#allocation7 + $0x1e0] sm:$0xff]  ;;  %v1695_v40 = vshrl.u32 %v97_v39, 7 }
  0x66   :  { %1326 = vmatprep.subr.bf16.mxu1 %v1325_v23  ;;  %v334_v50 = vld [vmem:[#allocation7 + $0x1b0] sm:$0xff]  ;;  %v341_v52 = vld [vmem:[#allocation7 + $0x1e8] sm:$0xff]  ;;  %v1335_v54 = vpack.c.bf16 %v321_v48, %v318_v47  ;;  %v343_v58 = vld [vmem:[#allocation7 + $0x1f8] sm:$0xff] }
  0x67   :  { %v1219_v55 = vpack.c.bf16 %v337_v51, %v334_v50  ;;  %v1221_v56 = vpack.c.bf16 %v344_v53, %v341_v52  ;;  %v347_v59 = vld [vmem:[#allocation7 + $0x218] sm:$0xff]  ;;  %v350_v60 = vld [vmem:[#allocation7 + $0x230] sm:$0xff]  ;;  %v1223_v61 = vpack.c.bf16 %v343_v58, %v340_v57  ;;  %v349_v1 = vld [vmem:[#allocation7 + $0x228] sm:$0xff]  ;;  %v99_v41 = vsub.s32 0, %v1695_v40 }
  0x68   :  { %1204 = vmatpush1.bf16.msra.mxu0 %v1203_v9  ;;  %v1225_v62 = vpack.c.bf16 %v350_v60, %v347_v59  ;;  %v346_v63 = vld [vmem:[#allocation7 + $0x210] sm:$0xff]  ;;  %v353_v2 = vld [vmem:[#allocation7 + $0x248] sm:$0xff]  ;;  %v356_v3 = vld [vmem:[#allocation7 + $0x260] sm:$0xff]  ;;  %v103_v43 = vsub.s32 1, %v1695_v40 }
  0x69   :  { %1206 = vmatprep.subr.bf16.mxu0 %v1205_v14  ;;  %1328 = vmatpush3.bf16.msra.mxu1 %v1327_v32  ;;  %v1227_v4 = vpack.c.bf16 %v349_v1, %v346_v63  ;;  %v1229_v5 = vpack.c.bf16 %v356_v3, %v353_v2  ;;  %v352_v6 = vld [vmem:[#allocation7 + $0x240] sm:$0xff]  ;;  %v355_v7 = vld [vmem:[#allocation7 + $0x258] sm:$0xff]  ;;  %v362_v9 = vld [vmem:[#allocation7 + $0x290] sm:$0xff] }
  0x6a   :  { %1330 = vmatprep.subr.bf16.mxu1 %v1329_v35  ;;  %v359_v8 = vld [vmem:[#allocation7 + $0x278] sm:$0xff]  ;;  %v1231_v10 = vpack.c.bf16 %v355_v7, %v352_v6  ;;  %v358_v12 = vld [vmem:[#allocation7 + $0x270] sm:$0xff]  ;;  %v361_v13 = vld [vmem:[#allocation7 + $0x288] sm:$0xff] }
  0x6b   :  { %v1233_v11 = vpack.c.bf16 %v362_v9, %v359_v8  ;;  %v365_v14 = vld [vmem:[#allocation7 + $0x2a8] sm:$0xff]  ;;  %v368_v15 = vld [vmem:[#allocation7 + $0x2c0] sm:$0xff]  ;;  %v1235_v16 = vpack.c.bf16 %v361_v13, %v358_v12  ;;  %v367_v19 = vld [vmem:[#allocation7 + $0x2b8] sm:$0xff] }
  0x6c   :  { %1208 = vmatpush1.bf16.msra.mxu0 %v1207_v21  ;;  %v1237_v17 = vpack.c.bf16 %v368_v15, %v365_v14  ;;  %v364_v18 = vld [vmem:[#allocation7 + $0x2a0] sm:$0xff]  ;;  %v371_v21 = vld [vmem:[#allocation7 + $0x2d8] sm:$0xff]  ;;  %v374_v22 = vld [vmem:[#allocation7 + $0x2f0] sm:$0xff] }
  0x6d   :  { %1210 = vmatprep.subr.bf16.mxu0 %v1209_v26  ;;  %1332 = vmatpush3.bf16.msra.mxu1 %v1331_v44  ;;  %v1239_v20 = vpack.c.bf16 %v367_v19, %v364_v18  ;;  %v372_v23 = vld [vmem:[#allocation7 + $0x2e0] sm:$0xff]  ;;  %v1241_v24 = vpack.c.bf16 %v374_v22, %v371_v21  ;;  %v375_v25 = vld [vmem:[#allocation7 + $0x2f8] sm:$0xff]  ;;  %v370_v26 = vld [vmem:[#allocation7 + $0x2d0] sm:$0xff]  ;;  %v111_v44 = vsub.s32 3, %v1695_v40 }
  0x6e   :  { %1334 = vmatprep.subr.bf16.mxu1 %v1333_v46  ;;  %v373_v27 = vld [vmem:[#allocation7 + $0x2e8] sm:$0xff]  ;;  %v1337_v28 = vpack.c.bf16 %v375_v25, %v372_v23  ;;  %v324_v30 = vld [vmem:[#allocation7 + $0x160] sm:$0xff]  ;;  %v327_v31 = vld [vmem:[#allocation7 + $0x178] sm:$0xff] }
  0x6f   :  { %v1243_v29 = vpack.c.bf16 %v373_v27, %v370_v26  ;;  %v1339_v32 = vpack.c.bf16 %v327_v31, %v324_v30  ;;  %v380_v34 = vld [vmem:[#allocation7 + $0x320] sm:$0xff]  ;;  %v426_v35 = vld [vmem:[#allocation7 + $0x490] sm:$0xff]  ;;  %v429_v37 = vld [vmem:[#allocation7 + $0x4a8] sm:$0xff] }
  0x70   :  { %1212 = vmatpush1.bf16.msra.mxu0 %v1211_v33  ;;  %v377_v33 = vld [vmem:[#allocation7 + $0x308] sm:$0xff]  ;;  %v1701_v42 = vld [vmem:[%s1755_s2] sm:$0xf]  ;;  %v376_v48 = vld [vmem:[#allocation7 + $0x300] sm:$0xff] }
  0x71   :  { %1214 = vmatprep.subr.bf16.mxu0 %v1213_v38  ;;  %1336 = vmatpush3.bf16.msra.mxu1 %v1335_v54  ;;  %v1245_v36 = vpack.c.bf16 %v380_v34, %v377_v33  ;;  %v1341_v38 = vpack.c.bf16 %v429_v37, %v426_v35  ;;  %v104_v46 = vrot.slane %v1701_v42, %v103_v43  ;;  %v378_v53 = vld [vmem:[#allocation7 + $0x310] sm:$0xff]  ;;  %v381_v54 = vld [vmem:[#allocation7 + $0x328] sm:$0xff]  ;;  %v432_v58 = vld [vmem:[#allocation7 + $0x4c0] sm:$0xff] }
  0x72   :  { %1338 = vmatprep.subr.bf16.mxu1 %v1337_v28  ;;  %v112_v50 = vrot.slane %v1701_v42, %v111_v44  ;;  %v386_v57 = vld [vmem:[#allocation7 + $0x350] sm:$0xff]  ;;  %v435_v59 = vld [vmem:[#allocation7 + $0x4d8] sm:$0xff]  ;;  %v1343_v1 = vpack.c.bf16 %v381_v54, %v378_v53  ;;  %v385_v3 = vld [vmem:[#allocation7 + $0x348] sm:$0xff] }
  0x73   :  { %v382_v2 = vld [vmem:[#allocation7 + $0x330] sm:$0xff]  ;;  %v1345_v7 = vpack.c.bf16 %v435_v59, %v432_v58  ;;  %v384_v8 = vld [vmem:[#allocation7 + $0x340] sm:$0xff]  ;;  %v387_v9 = vld [vmem:[#allocation7 + $0x358] sm:$0xff] }
  0x74   :  { %1216 = vmatpush1.bf16.msra.mxu0 %v1215_v45  ;;  %v100_v45 = vrot.slane %v1701_v42, %v99_v41  ;;  %v438_v12 = vld [vmem:[#allocation7 + $0x4f0] sm:$0xff]  ;;  %v441_v13 = vld [vmem:[#allocation7 + $0x508] sm:$0xff]  ;;  %v1251_v15 = vpack.c.bf16 %v385_v3, %v382_v2  ;;  %v391_v18 = vld [vmem:[#allocation7 + $0x378] sm:$0xff] }
  0x75   :  { %1218 = vmatprep.subr.bf16.mxu0 %v1217_v49  ;;  %1340 = vmatpush3.bf16.msra.mxu1 %v1339_v32  ;;  %v379_v49 = vld [vmem:[#allocation7 + $0x318] sm:$0xff]  ;;  %v390_v21 = vld [vmem:[#allocation7 + $0x370] sm:$0xff]  ;;  %v393_v22 = vld [vmem:[#allocation7 + $0x388] sm:$0xff] }
  0x76   :  { %1342 = vmatprep.subr.bf16.mxu1 %v1341_v38  ;;  %v1247_v63 = vpack.c.bf16 %v379_v49, %v376_v48  ;;  %v395_v23 = vld [vmem:[#allocation7 + $0x398] sm:$0xff]  ;;  %v444_v25 = vld [vmem:[#allocation7 + $0x520] sm:$0xff]  ;;  %v1351_v28 = vpack.c.bf16 %v393_v22, %v390_v21  ;;  %v397_v30 = vld [vmem:[#allocation7 + $0x3a8] sm:$0xff] }
  0x77   :  { %v447_v26 = vld [vmem:[#allocation7 + $0x538] sm:$0xff]  ;;  %v396_v33 = vld [vmem:[#allocation7 + $0x3a0] sm:$0xff]  ;;  %v401_v35 = vld [vmem:[#allocation7 + $0x3c8] sm:$0xff] }
  0x78   :  { %1220 = vmatpush1.bf16.msra.mxu0 %v1219_v55  ;;  %v383_v55 = vld [vmem:[#allocation7 + $0x338] sm:$0xff]  ;;  %v1353_v32 = vpack.c.bf16 %v447_v26, %v444_v25  ;;  %v450_v37 = vld [vmem:[#allocation7 + $0x550] sm:$0xff]  ;;  %v453_v38 = vld [vmem:[#allocation7 + $0x568] sm:$0xff] }
  0x79   :  { %1222 = vmatprep.subr.bf16.mxu0 %v1221_v56  ;;  %v1249_v6 = vpack.c.bf16 %v386_v57, %v383_v55  ;;  %v399_v34 = vld [vmem:[#allocation7 + $0x3b8] sm:$0xff]  ;;  %v1357_v48 = vpack.c.bf16 %v453_v38, %v450_v37  ;;  %v402_v49 = vld [vmem:[#allocation7 + $0x3d0] sm:$0xff]  ;;  %v456_v53 = vld [vmem:[#allocation7 + $0x580] sm:$0xff] }
  0x7a   :  { %v1355_v44 = vpack.c.bf16 %v399_v34, %v396_v33  ;;  %v459_v54 = vld [vmem:[#allocation7 + $0x598] sm:$0xff]  ;;  %v406_v57 = vld [vmem:[#allocation7 + $0x3f0] sm:$0xff]  ;;  %v409_v58 = vld [vmem:[#allocation7 + $0x408] sm:$0xff] }
  0x7b   :  { %v416_v2 = vld [vmem:[#allocation7 + $0x440] sm:$0xff]  ;;  %v462_v3 = vld [vmem:[#allocation7 + $0x5b0] sm:$0xff]  ;;  %v423_v26 = vld [vmem:[#allocation7 + $0x478] sm:$0xff] }
  0x7c   :  { %1224 = vmatpush1.bf16.msra.mxu0 %v1223_v61  ;;  %v418_v21 = vld [vmem:[#allocation7 + $0x450] sm:$0xff]  ;;  %v420_v25 = vld [vmem:[#allocation7 + $0x460] sm:$0xff]  ;;  %v427_v33 = vld [vmem:[#allocation7 + $0x498] sm:$0xff] }
  0x7d   :  { %1226 = vmatprep.subr.bf16.mxu0 %v1225_v62  ;;  %v431_v34 = vld [vmem:[#allocation7 + $0x4b8] sm:$0xff] }
  0x80   :  { %1228 = vmatpush1.bf16.msra.mxu0 %v1227_v4 }
  0x81   :  { %1230 = vmatprep.subr.bf16.mxu0 %v1229_v5 }
  0x84   :  { %1232 = vmatpush1.bf16.msra.mxu0 %v1231_v10  ;;  %v389_v10 = vld [vmem:[#allocation7 + $0x368] sm:$0xff] }
  0x85   :  { %1234 = vmatprep.subr.bf16.mxu0 %v1233_v11  ;;  %v392_v11 = vld [vmem:[#allocation7 + $0x380] sm:$0xff] }
  0x86   :  { %v1253_v19 = vpack.c.bf16 %v392_v11, %v389_v10 }
  0x88   :  { %1236 = vmatpush1.bf16.msra.mxu0 %v1235_v16  ;;  %v1347_v16 = vpack.c.bf16 %v387_v9, %v384_v8  ;;  %v412_v8 = vld [vmem:[#allocation7 + $0x420] sm:$0xff]  ;;  %v415_v9 = vld [vmem:[#allocation7 + $0x438] sm:$0xff] }
  0x89   :  { %1238 = vmatprep.subr.bf16.mxu0 %v1237_v17  ;;  %v388_v17 = vld [vmem:[#allocation7 + $0x360] sm:$0xff] }
  0x8a   :  { %v1255_v27 = vpack.c.bf16 %v391_v18, %v388_v17  ;;  %v471_v17 = vld [vmem:[#allocation7 + $0x5f8] sm:$0xff] }
  0x8c   :  { %1240 = vmatpush1.bf16.msra.mxu0 %v1239_v20  ;;  %v1349_v20 = vpack.c.bf16 %v441_v13, %v438_v12  ;;  %v414_v12 = vld [vmem:[#allocation7 + $0x430] sm:$0xff]  ;;  %v417_v13 = vld [vmem:[#allocation7 + $0x448] sm:$0xff] }
  0x8d   :  { %1242 = vmatprep.subr.bf16.mxu0 %v1241_v24  ;;  %v398_v24 = vld [vmem:[#allocation7 + $0x3b0] sm:$0xff] }
  0x8e   :  { %v1257_v31 = vpack.c.bf16 %v398_v24, %v395_v23  ;;  %v421_v24 = vld [vmem:[#allocation7 + $0x468] sm:$0xff] }
  0x90   :  { %1244 = vmatpush1.bf16.msra.mxu0 %v1243_v29  ;;  %v394_v29 = vld [vmem:[#allocation7 + $0x390] sm:$0xff] }
  0x91   :  { %1246 = vmatprep.subr.bf16.mxu0 %v1245_v36  ;;  %v404_v36 = vld [vmem:[#allocation7 + $0x3e0] sm:$0xff]  ;;  %v1259_v39 = vpack.c.bf16 %v397_v30, %v394_v29  ;;  %v1371_v30 = vpack.c.bf16 %v423_v26, %v420_v25  ;;  %v792_v26 = vld [vmem:[#allocation8 + $0x90] sm:$0xff] }
 0x126   :  { %v200_v47 = vpop.f32.mrb[0].mxu0 }
 0x127   :  { %v201_v51 = vadd.f32 %v200_v47, %v100_v45  ;;  %v202_v52 = vpop.f32.mrb[1].mxu0  ;;  %v400_v45 = vld [vmem:[#allocation7 + $0x3c0] sm:$0xff]  ;;  %v1261_v47 = vpack.c.bf16 %v404_v36, %v401_v35  ;;  %v434_v35 = vld [vmem:[#allocation7 + $0x4d0] sm:$0xff] }
 0x128   :  { %v203_v56 = vadd.f32 %v202_v52, %v104_v46  ;;  %v403_v46 = vld [vmem:[#allocation7 + $0x3d8] sm:$0xff]  ;;  %v410_v52 = vld [vmem:[#allocation7 + $0x410] sm:$0xff]  ;;  %v1281_v38 = vpack.c.bf16 %v434_v35, %v431_v34  ;;  %v778_v34 = vld [vmem:[#allocation8 + $0x20] sm:$0xff] }
 0x129   :  { %v1712_v60 = vpop.f32.mrb[0].mxu1  ;;  %v276_v5 = vmax.f32 %v201_v51, 0.0  ;;  %v407_v51 = vld [vmem:[#allocation7 + $0x3f8] sm:$0xff]  ;;  %v1263_v55 = vpack.c.bf16 %v403_v46, %v400_v45  ;;  %v440_v45 = vld [vmem:[#allocation7 + $0x500] sm:$0xff]  ;;  %v779_v35 = vld [vmem:[#allocation8 + $0x28] sm:$0xff] }
 0x12a   :  { %v273_v61 = vpop.f32.mrb[1].mxu1  ;;  %v277_v62 = vmax.f32 %v203_v56, 0.0  ;;  %v1265_v59 = vpack.c.bf16 %v410_v52, %v407_v51  ;;  %v446_v51 = vld [vmem:[#allocation7 + $0x530] sm:$0xff] }
 0x12b   :  { %v274_v4 = vadd.f32 %v273_v61, %v112_v50  ;;  %v405_v50 = vld [vmem:[#allocation7 + $0x3e8] sm:$0xff]  ;;  %v1361_v61 = vpack.c.bf16 %v459_v54, %v456_v53  ;;  %v442_v54 = vld [vmem:[#allocation7 + $0x510] sm:$0xff] }
 0x12c   :  { %553 = vmatprep.mubr.f32.mxu0 %v277_v62  ;;  %695 = vmatprep.mubr.f32.mxu1 %v277_v62  ;;  %v1359_v56 = vpack.c.bf16 %v405_v50, %v402_v49  ;;  %v408_v62 = vld [vmem:[#allocation7 + $0x400] sm:$0xff]  ;;  %v439_v49 = vld [vmem:[#allocation7 + $0x4f8] sm:$0xff] }
 0x12d   :  { %v279_v14 = vmax.f32 %v274_v4, 0.0  ;;  %554 = vmatmul.mubr.f32.vlgmr.msra.gmra.mrb[2].mxu0 %v276_v5  ;;  %696 = vmatmul.mubr.f32.vlgmr.msra.gmra.mrb[2].mxu1 %v276_v5  ;;  %v465_v4 = vld [vmem:[#allocation7 + $0x5c8] sm:$0xff]  ;;  %v107_v5 = vsub.s32 2, %v1695_v40  ;;  %v443_v50 = vld [vmem:[#allocation7 + $0x518] sm:$0xff]  ;;  %v810_v40 = vld [vmem:[#allocation8 + $0x120] sm:$0xff] }
 0x12e   :  { %1248 = vmatpush1.bf16.msra.mxu0 %v1247_v63  ;;  %1344 = vmatpush3.bf16.msra.mxu1 %v1343_v1  ;;  %v411_v63 = vld [vmem:[#allocation7 + $0x418] sm:$0xff]  ;;  %v413_v1 = vld [vmem:[#allocation7 + $0x428] sm:$0xff]  ;;  %v1365_v11 = vpack.c.bf16 %v465_v4, %v462_v3  ;;  %v1289_v53 = vpack.c.bf16 %v446_v51, %v443_v50  ;;  %v454_v4 = vld [vmem:[#allocation7 + $0x570] sm:$0xff] }
 0x12f   :  { %1250 = vmatprep.subr.bf16.mxu0 %v1249_v6  ;;  %1346 = vmatprep.subr.bf16.mxu1 %v1345_v7  ;;  %v1267_v6 = vpack.c.bf16 %v409_v58, %v406_v57  ;;  %v1363_v7 = vpack.c.bf16 %v411_v63, %v408_v62  ;;  %v1269_v10 = vpack.c.bf16 %v416_v2, %v413_v1  ;;  %v452_v57 = vld [vmem:[#allocation7 + $0x560] sm:$0xff]  ;;  %v451_v62 = vld [vmem:[#allocation7 + $0x558] sm:$0xff]  ;;  %v458_v1 = vld [vmem:[#allocation7 + $0x590] sm:$0xff] }
 0x130   :  { %765 = vmatprep.mubr.f32.mxu1 %v279_v14  ;;  %624 = vmatprep.mubr.f32.mxu0 %v279_v14  ;;  %v419_v14 = vld [vmem:[#allocation7 + $0x458] sm:$0xff]  ;;  %v108_v18 = vrot.slane %v1701_v42, %v107_v5  ;;  %v1275_v42 = vpack.c.bf16 %v421_v24, %v418_v21  ;;  %v791_v21 = vld [vmem:[#allocation8 + $0x88] sm:$0xff]  ;;  %v800_v51 = vld [vmem:[#allocation8 + $0xd0] sm:$0xff] }
 0x131   :  { %v455_v63 = vld [vmem:[#allocation7 + $0x578] sm:$0xff]  ;;  %v775_v24 = vld [vmem:[#allocation8 + $0x8] sm:$0xff] }
 0x132   :  { %1252 = vmatpush1.bf16.msra.mxu0 %v1251_v15  ;;  %1348 = vmatpush3.bf16.msra.mxu1 %v1347_v16  ;;  %v422_v15 = vld [vmem:[#allocation7 + $0x470] sm:$0xff]  ;;  %v468_v16 = vld [vmem:[#allocation7 + $0x5e0] sm:$0xff]  ;;  %v1719_v29 = vadd.f32 %v1712_v60, %v108_v18  ;;  %v1297_v3 = vpack.c.bf16 %v458_v1, %v455_v63  ;;  %v469_v18 = vld [vmem:[#allocation7 + $0x5e8] sm:$0xff] }
 0x133   :  { %1254 = vmatprep.subr.bf16.mxu0 %v1253_v19  ;;  %1350 = vmatprep.subr.bf16.mxu1 %v1349_v20  ;;  %v1271_v19 = vpack.c.bf16 %v415_v9, %v412_v8  ;;  %v1367_v20 = vpack.c.bf16 %v417_v13, %v414_v12  ;;  %v1273_v22 = vpack.c.bf16 %v422_v15, %v419_v14  ;;  %v430_v60 = vld [vmem:[#allocation7 + $0x4b0] sm:$0xff]  ;;  %v464_v8 = vld [vmem:[#allocation7 + $0x5c0] sm:$0xff]  ;;  %v463_v12 = vld [vmem:[#allocation7 + $0x5b8] sm:$0xff] }
 0x134   :  { %v1369_v23 = vpack.c.bf16 %v471_v17, %v468_v16  ;;  %v278_v36 = vmax.f32 %v1719_v29, 0.0  ;;  %v467_v13 = vld [vmem:[#allocation7 + $0x5d8] sm:$0xff]  ;;  %v470_v14 = vld [vmem:[#allocation7 + $0x5f0] sm:$0xff]  ;;  %v783_v50 = vld [vmem:[#allocation8 + $0x48] sm:$0xff] }
 0x135   :  { %v1305_v16 = vpack.c.bf16 %v470_v14, %v467_v13  ;;  %v466_v17 = vld [vmem:[#allocation7 + $0x5d0] sm:$0xff]  ;;  %v787_v63 = vld [vmem:[#allocation8 + $0x68] sm:$0xff]  ;;  %v472_v13 = vld [vmem:[%s1757_s4] sm:$0x7] }
 0x136   :  { %1256 = vmatpush1.bf16.msra.mxu0 %v1255_v27  ;;  %1352 = vmatpush3.bf16.msra.mxu1 %v1351_v28  ;;  %v425_v27 = vld [vmem:[#allocation7 + $0x488] sm:$0xff]  ;;  %v428_v28 = vld [vmem:[#allocation7 + $0x4a0] sm:$0xff]  ;;  %v485_v14 = vrot.slane %v472_v13, %v107_v5 }
 0x137   :  { %1258 = vmatprep.subr.bf16.mxu0 %v1257_v31  ;;  %1354 = vmatprep.subr.bf16.mxu1 %v1353_v32  ;;  %v1277_v31 = vpack.c.bf16 %v428_v28, %v425_v27  ;;  %v424_v32 = vld [vmem:[#allocation7 + $0x480] sm:$0xff]  ;;  %v793_v27 = vld [vmem:[#allocation8 + $0x98] sm:$0xff]  ;;  %v776_v28 = vld [vmem:[#allocation8 + $0x10] sm:$0xff] }
 0x138   :  { %v1279_v37 = vpack.c.bf16 %v427_v33, %v424_v32  ;;  %v1377_v29 = vpack.c.bf16 %v793_v27, %v792_v26  ;;  %v807_v26 = vld [vmem:[#allocation8 + $0x108] sm:$0xff] }
 0x13a   :  { %1260 = vmatpush1.bf16.msra.mxu0 %v1259_v39  ;;  %1356 = vmatpush3.bf16.msra.mxu1 %v1355_v44  ;;  %v433_v39 = vld [vmem:[#allocation7 + $0x4c8] sm:$0xff] }
 0x13b   :  { %1262 = vmatprep.subr.bf16.mxu0 %v1261_v47  ;;  %1358 = vmatprep.subr.bf16.mxu1 %v1357_v48  ;;  %v437_v44 = vld [vmem:[#allocation7 + $0x4e8] sm:$0xff]  ;;  %v1283_v46 = vpack.c.bf16 %v433_v39, %v430_v60  ;;  %v436_v48 = vld [vmem:[#allocation7 + $0x4e0] sm:$0xff]  ;;  %v780_v39 = vld [vmem:[#allocation8 + $0x30] sm:$0xff] }
 0x13c   :  { %v1285_v47 = vpack.c.bf16 %v440_v45, %v437_v44  ;;  %v1287_v52 = vpack.c.bf16 %v439_v49, %v436_v48  ;;  %v781_v44 = vld [vmem:[#allocation8 + $0x38] sm:$0xff]  ;;  %v798_v45 = vld [vmem:[#allocation8 + $0xc0] sm:$0xff] }
 0x13d   :  { %v782_v49 = vld [vmem:[#allocation8 + $0x40] sm:$0xff] }
 0x13e   :  { %1264 = vmatpush1.bf16.msra.mxu0 %v1263_v55  ;;  %1360 = vmatpush3.bf16.msra.mxu1 %v1359_v56  ;;  %v445_v55 = vld [vmem:[#allocation7 + $0x528] sm:$0xff] }
 0x13f   :  { %1266 = vmatprep.subr.bf16.mxu0 %v1265_v59  ;;  %1362 = vmatprep.subr.bf16.mxu1 %v1361_v61  ;;  %v449_v56 = vld [vmem:[#allocation7 + $0x548] sm:$0xff]  ;;  %v1291_v58 = vpack.c.bf16 %v445_v55, %v442_v54  ;;  %v448_v61 = vld [vmem:[#allocation7 + $0x540] sm:$0xff]  ;;  %v784_v55 = vld [vmem:[#allocation8 + $0x50] sm:$0xff] }
 0x140   :  { %v1293_v59 = vpack.c.bf16 %v452_v57, %v449_v56  ;;  %v1295_v2 = vpack.c.bf16 %v451_v62, %v448_v61  ;;  %v785_v56 = vld [vmem:[#allocation8 + $0x58] sm:$0xff]  ;;  %v802_v57 = vld [vmem:[#allocation8 + $0xe0] sm:$0xff] }
 0x141   :  { %v786_v62 = vld [vmem:[#allocation8 + $0x60] sm:$0xff] }
 0x142   :  { %1268 = vmatpush1.bf16.msra.mxu0 %v1267_v6  ;;  %1364 = vmatpush3.bf16.msra.mxu1 %v1363_v7  ;;  %v457_v6 = vld [vmem:[#allocation7 + $0x588] sm:$0xff]  ;;  %v1399_v1 = vpack.c.bf16 %v787_v63, %v786_v62 }
 0x143   :  { %1270 = vmatprep.subr.bf16.mxu0 %v1269_v10  ;;  %1366 = vmatprep.subr.bf16.mxu1 %v1365_v11  ;;  %v461_v7 = vld [vmem:[#allocation7 + $0x5a8] sm:$0xff]  ;;  %v1299_v9 = vpack.c.bf16 %v457_v6, %v454_v4  ;;  %v460_v11 = vld [vmem:[#allocation7 + $0x5a0] sm:$0xff]  ;;  %v788_v6 = vld [vmem:[#allocation8 + $0x70] sm:$0xff] }
 0x144   :  { %v1301_v10 = vpack.c.bf16 %v464_v8, %v461_v7  ;;  %v1303_v15 = vpack.c.bf16 %v463_v12, %v460_v11  ;;  %v789_v7 = vld [vmem:[#allocation8 + $0x78] sm:$0xff] }
 0x145   :  { %v1403_v8 = vpack.c.bf16 %v789_v7, %v788_v6 }
 0x146   :  { %1272 = vmatpush1.bf16.msra.mxu0 %v1271_v19  ;;  %1368 = vmatpush3.bf16.msra.mxu1 %v1367_v20  ;;  %v1307_v19 = vpack.c.bf16 %v469_v18, %v466_v17  ;;  %v790_v20 = vld [vmem:[#allocation8 + $0x80] sm:$0xff] }
 0x147   :  { %1274 = vmatprep.subr.bf16.mxu0 %v1273_v22  ;;  %1370 = vmatprep.subr.bf16.mxu1 %v1369_v23  ;;  %v1373_v22 = vpack.c.bf16 %v791_v21, %v790_v20  ;;  %v774_v23 = vld [vmem:[#allocation8] sm:$0xff]  ;;  %v477_v20 = vrot.slane %v472_v13, %v99_v41  ;;  %v481_v21 = vrot.slane %v472_v13, %v103_v43  ;;  %v811_v41 = vld [vmem:[#allocation8 + $0x128] sm:$0xff] }
 0x148   :  { %v1375_v25 = vpack.c.bf16 %v775_v24, %v774_v23  ;;  %v1412_v43 = vpack.c.bf16 %v811_v41, %v810_v40 }
 0x14a   :  { %1276 = vmatpush1.bf16.msra.mxu0 %v1275_v42  ;;  %1372 = vmatpush3.bf16.msra.mxu1 %v1371_v30  ;;  %v777_v42 = vld [vmem:[#allocation8 + $0x18] sm:$0xff]  ;;  %v794_v30 = vld [vmem:[#allocation8 + $0xa0] sm:$0xff] }
 0x14b   :  { %1278 = vmatprep.subr.bf16.mxu0 %v1277_v31  ;;  %1374 = vmatprep.subr.bf16.mxu1 %v1373_v22  ;;  %v795_v31 = vld [vmem:[#allocation8 + $0xa8] sm:$0xff]  ;;  %v1379_v32 = vpack.c.bf16 %v777_v42, %v776_v28  ;;  %v808_v42 = vld [vmem:[#allocation8 + $0x110] sm:$0xff] }
 0x14c   :  { %v1381_v33 = vpack.c.bf16 %v795_v31, %v794_v30  ;;  %v809_v30 = vld [vmem:[#allocation8 + $0x118] sm:$0xff] }
 0x14d   :  { %766 = vmatmul.mubr.f32.vlgmr.msra.gmra.mrb[4].mxu1 %v278_v36  ;;  %v1409_v31 = vpack.c.bf16 %v809_v30, %v808_v42 }
 0x14e   :  { %1280 = vmatpush1.bf16.msra.mxu0 %v1279_v37  ;;  %1376 = vmatpush3.bf16.msra.mxu1 %v1375_v25  ;;  %v797_v37 = vld [vmem:[#allocation8 + $0xb8] sm:$0xff]  ;;  %v806_v25 = vld [vmem:[#allocation8 + $0x100] sm:$0xff] }
 0x14f   :  { %1282 = vmatprep.subr.bf16.mxu0 %v1281_v38  ;;  %1378 = vmatprep.subr.bf16.mxu1 %v1377_v29  ;;  %v1383_v38 = vpack.c.bf16 %v779_v35, %v778_v34  ;;  %v1406_v29 = vpack.c.bf16 %v807_v26, %v806_v25  ;;  %v814_v35 = vld [vmem:[#allocation8 + $0x140] sm:$0xff] }
 0x152   :  { %1284 = vmatpush1.bf16.msra.mxu0 %v1283_v46  ;;  %1380 = vmatpush3.bf16.msra.mxu1 %v1379_v32  ;;  %v799_v46 = vld [vmem:[#allocation8 + $0xc8] sm:$0xff]  ;;  %v812_v32 = vld [vmem:[#allocation8 + $0x130] sm:$0xff] }
 0x153   :  { %1286 = vmatprep.subr.bf16.mxu0 %v1285_v47  ;;  %1382 = vmatprep.subr.bf16.mxu1 %v1381_v33  ;;  %v1387_v47 = vpack.c.bf16 %v781_v44, %v780_v39  ;;  %v1389_v48 = vpack.c.bf16 %v799_v46, %v798_v45  ;;  %v813_v33 = vld [vmem:[#allocation8 + $0x138] sm:$0xff]  ;;  %v818_v39 = vld [vmem:[#allocation8 + $0x160] sm:$0xff]  ;;  %v819_v44 = vld [vmem:[#allocation8 + $0x168] sm:$0xff] }
 0x154   :  { %v1415_v34 = vpack.c.bf16 %v813_v33, %v812_v32  ;;  %v1424_v45 = vpack.c.bf16 %v819_v44, %v818_v39  ;;  %v820_v46 = vld [vmem:[#allocation8 + $0x170] sm:$0xff] }
 0x156   :  { %1288 = vmatpush1.bf16.msra.mxu0 %v1287_v52  ;;  %1384 = vmatpush3.bf16.msra.mxu1 %v1383_v38  ;;  %v801_v52 = vld [vmem:[#allocation8 + $0xd8] sm:$0xff]  ;;  %v816_v38 = vld [vmem:[#allocation8 + $0x150] sm:$0xff] }
 0x157   :  { %1290 = vmatprep.subr.bf16.mxu0 %v1289_v53  ;;  %v1391_v53 = vpack.c.bf16 %v783_v50, %v782_v49  ;;  %v1393_v54 = vpack.c.bf16 %v801_v52, %v800_v51 }
 0x15a   :  { %1292 = vmatpush1.bf16.msra.mxu0 %v1291_v58  ;;  %v803_v58 = vld [vmem:[#allocation8 + $0xe8] sm:$0xff] }
 0x15b   :  { %1294 = vmatprep.subr.bf16.mxu0 %v1293_v59  ;;  %v1395_v59 = vpack.c.bf16 %v785_v56, %v784_v55  ;;  %v1397_v61 = vpack.c.bf16 %v803_v58, %v802_v57  ;;  %v1010_v56 = vld [vmem:[%s1760_s7] ss:$0 sm:$0xff] }
 0x15e   :  { %1296 = vmatpush1.bf16.msra.mxu0 %v1295_v2  ;;  %v804_v2 = vld [vmem:[#allocation8 + $0xf0] sm:$0xff] }
 0x15f   :  { %1298 = vmatprep.subr.bf16.mxu0 %v1297_v3  ;;  %v805_v3 = vld [vmem:[#allocation8 + $0xf8] sm:$0xff] }
 0x160   :  { %v1401_v4 = vpack.c.bf16 %v805_v3, %v804_v2 }
 0x162   :  { %1300 = vmatpush1.bf16.msra.mxu0 %v1299_v9  ;;  %v1578_v9 = vmov 0.0|0.0  }
 0x163   :  { %1302 = vmatprep.subr.bf16.mxu0 %v1301_v10 }
 0x166   :  { %1304 = vmatpush1.bf16.msra.mxu0 %v1303_v15 }
 0x167   :  { %1306 = vmatprep.subr.bf16.mxu0 %v1305_v16 }
 0x16a   :  { %1308 = vmatpush1.bf16.msra.mxu0 %v1307_v19 }
 0x16d   :  { %625 = vmatmul.mubr.f32.vlgmr.msra.gmra.mrb[2].mxu0 %v278_v36  ;;  %v796_v36 = vld [vmem:[#allocation8 + $0xb0] sm:$0xff] }
 0x16e   :  { %v1385_v60 = vpack.c.bf16 %v797_v37, %v796_v36  ;;  %v815_v36 = vld [vmem:[#allocation8 + $0x148] sm:$0xff] }
 0x16f   :  { %v1418_v37 = vpack.c.bf16 %v815_v36, %v814_v35 }
 0x170   :  { %1386 = vmatprep.subr.bf16.mxu1 %v1385_v60  ;;  %v817_v60 = vld [vmem:[#allocation8 + $0x158] sm:$0xff] }
 0x171   :  { %1388 = vmatpush3.bf16.msra.mxu1 %v1387_v47  ;;  %v821_v47 = vld [vmem:[#allocation8 + $0x178] sm:$0xff] }
 0x172   :  { %1390 = vmatprep.subr.bf16.mxu1 %v1389_v48  ;;  %v1427_v48 = vpack.c.bf16 %v821_v47, %v820_v46 }
 0x175   :  { %1392 = vmatpush3.bf16.msra.mxu1 %v1391_v53  ;;  %v1009_v53 = vld [vmem:[%s1759_s6] ss:$0 sm:$0xff] }
 0x176   :  { %1394 = vmatprep.subr.bf16.mxu1 %v1393_v54 }
 0x179   :  { %1396 = vmatpush3.bf16.msra.mxu1 %v1395_v59  ;;  %v1011_v59 = vld [vmem:[%s1761_s8] ss:$0 sm:$0xff] }
 0x17a   :  { %1398 = vmatprep.subr.bf16.mxu1 %v1397_v61 }
 0x17d   :  { %1400 = vmatpush3.bf16.msra.mxu1 %v1399_v1 }
 0x17e   :  { %1402 = vmatprep.subr.bf16.mxu1 %v1401_v4 }
 0x181   :  { %1404 = vmatpush3.bf16.msra.mxu1 %v1403_v8 }
 0x182   :  { %1405 = vmatprep.subr.bf16.mxu1 %v1578_v9 }
 0x200   :  { %v1044_v10 = vpop.f32.mrb[2].mxu1 }
 0x201   :  { %v1045_v11 = vpop.f32.mrb[3].mxu1 }
 0x202   :  { %v1046_v12 = vadd.f32 %v1045_v11, %v1044_v10 }
 0x204   :  { %v698_v17 = vadd.f32 %v1046_v12, %v485_v14 }
 0x220   :  { %v1079_v15 = vpop.f32.mrb[4].mxu1 }
 0x221   :  { %v1080_v16 = vpop.f32.mrb[5].mxu1 }
 0x222   :  { %v1081_v18 = vadd.f32 %v1080_v16, %v1079_v15 }
 0x224   :  { %v768_v19 = vadd.f32 %v1081_v18, %v698_v17 }
 0x226   :  { %v773_v49 = vmax.f32 %v768_v19, 0.0 }
 0x240   :  { %v626_v22 = vpop.f32.mrb[2].mxu0 }
 0x241   :  { %v1429_v23 = vadd.f32 %v626_v22, %v477_v20  ;;  %v628_v24 = vpop.f32.mrb[3].mxu0 }
 0x242   :  { %v1430_v27 = vadd.f32 %v628_v24, %v481_v21 }
 0x243   :  { %v771_v5 = vmax.f32 %v1429_v23, 0.0 }
 0x244   :  { %v772_v28 = vmax.f32 %v1430_v27, 0.0 }
 0x246   :  { %893 = vmatprep.mubr.f32.mxu1 %v772_v28 }
 0x247   :  { %894 = vmatmul.mubr.f32.vlgmr.msra.gmra.mrb[6].mxu1 %v771_v5 }
 0x248   :  { %1407 = vmatpush3.bf16.msra.mxu1 %v1406_v29  ;;  %1166 = vmatprep.mubr.msk.f32.mxu1 %vm1579_vm4, %v1576_v0  ;;  %v1421_v0 = vpack.c.bf16 %v817_v60, %v816_v38 }
 0x249   :  { %1408 = vmatprep.subr.bf16.mxu1 %v1578_v9 }
 0x24c   :  { %1410 = vmatpush3.bf16.msra.mxu1 %v1409_v31 }
 0x24d   :  { %1411 = vmatprep.subr.bf16.mxu1 %v1578_v9 }
 0x250   :  { %1413 = vmatpush3.bf16.msra.mxu1 %v1412_v43 }
 0x251   :  { %1414 = vmatprep.subr.bf16.mxu1 %v1578_v9 }
 0x254   :  { %1416 = vmatpush3.bf16.msra.mxu1 %v1415_v34 }
 0x255   :  { %1417 = vmatprep.subr.bf16.mxu1 %v1578_v9 }
 0x258   :  { %1419 = vmatpush3.bf16.msra.mxu1 %v1418_v37 }
 0x259   :  { %1420 = vmatprep.subr.bf16.mxu1 %v1578_v9 }
 0x25c   :  { %1422 = vmatpush3.bf16.msra.mxu1 %v1421_v0 }
 0x25d   :  { %1423 = vmatprep.subr.bf16.mxu1 %v1578_v9 }
 0x260   :  { %1425 = vmatpush3.bf16.msra.mxu1 %v1424_v45 }
 0x261   :  { %1426 = vmatprep.subr.bf16.mxu1 %v1578_v9 }
 0x264   :  { %1428 = vmatpush3.bf16.msra.mxu1 %v1427_v48 }
 0x267   :  { %1167 = vmatmul.mubr.f32.vlgmr.msra.gmra.mrb[8].mxu1 %v773_v49 }
 0x31a   :  { %v1114_v50 = vpop.f32.mrb[6].mxu1 }
 0x31b   :  { %v1115_v51 = vpop.f32.mrb[7].mxu1 }
 0x31c   :  { %v1116_v52 = vadd.f32 %v1115_v51, %v1114_v50 }
 0x31e   :  { %v896_v54 = vadd.f32 %v1116_v52, %v1009_v53 }
 0x33a   :  { %v965_v55 = vpop.f32.mrb[8].mxu1 }
 0x33b   :  { %v966_v57 = vadd.f32 %v965_v55, %v896_v54  ;;  %v1168_v58 = vpop.f32.mrb[9].mxu1 }
 0x33d   :  { %v976_v61 = vmax.f32 %v966_v57, %v1010_v56 }
 0x33f   :  { %v984_v62 = vmin.f32 %v976_v61, %v1011_v59 }
 0x341   :  { %985 = vst [vmem:[#allocation10] sm:$0xff] %v984_v62 }
 0x342   :  { %1547 = shalt.err (!%p1544_p8)
}
 0x343   :  { %s1548_s27 = scalar_lea.hbm %s1762_s9, 128 }
 0x344   :  { %p1549_p9 = scmp.ne.s32.totalorder %s1762_s9, %s1548_s27  ;;  %p1552_p10 = scmp.lt.u32.totalorder %s1548_s27, %s1762_s9 }
 0x346   :  { %p1554_p11 = pnand %p1552_p10, %p1549_p9 }
 0x348   :  { %1557 = shalt.err (!%p1554_p11)
}
 0x349   :  { %995 = dma.vmem_to_hbm [thread:$0]  %s993_s24, 128, %s1762_s9, [#allocation4]  }
 0x34a   :  { %1564 = dma.done.wait [#allocation4], 128  }
 0x34b   :  { %1565 = vsyncadd [#allocation4], 4294967168 }
 0x34c   :  { %999 = vsyncpa [#allocation3], 1 }
 0x34d   :  { %1000 = vsyncpa [#allocation6], 1 }
 0x34e   :  { %1001 = vsyncpa [#allocation9], 1 }
 0x34f   :  { %1002 = vsyncpa [#allocation4], 1 }

</bundles_post_ra>
